<compile_context>
chip_gen: v7x
topology: tpu7x:2x2x1
jax: 0.10.0
libtpu: 0.0.40
codegen_flags: <defaults>
</compile_context>

<pallas_src>
import jax
import jax.numpy as jnp
from jax import lax
from jax.experimental import pallas as pl
from jax.experimental.pallas import tpu as pltpu

EPS = 1e-8


def _leaky_relu(v, slope=0.2):
    return jnp.where(v >= 0, v, slope * v)


def _vmem_budget():
    """(per-block tile budget, scoped vmem limit) derived from the chip."""
    cap = None
    try:
        info = pltpu.get_tpu_info()
        cap = getattr(info, "vmem_capacity_bytes", None)
    except Exception:
        cap = None
    if not cap:
        cap = 64 << 20          # conservative (v7x per-TC); v5e/v6e have 128 MiB
    usable = int(cap * 0.75)    # leave headroom for compiler-internal scratch
    block = max(usable // 5, 1 << 20)   # 2x in + 2x out double buffers + slack
    return block, usable


def _pick_tile(hw, c, itemsize, budget_bytes):
    """Return (T, hw_padded): T is a multiple of 128 whose (C, T) block fits the
    budget; hw_padded is hw rounded up to a multiple of T (zero-padded in the
    wrapper).  Never returns an over-budget block."""
    bytes_per_col = max(c * itemsize, 1)
    max_t = max((budget_bytes // bytes_per_col) // 128 * 128, 128)
    hw128 = -(-hw // 128) * 128
    if hw128 <= max_t:
        return hw128, hw128                        # whole image in one tile
    # Tiled: prefer a T that divides hw exactly (no padding), else pad to max_t.
    best = 0
    t = 128
    while t <= max_t:
        if hw % t == 0:
            best = t
        t += 128
    if best:
        return best, hw
    t = max_t
    return t, -(-hw // t) * t


def layer_epilogue(x_nchw, noise_nchw, dlatent, noise_weight, style_w, style_b,
                   *, use_wscale=True, use_noise=True, use_pixel_norm=True,
                   use_instance_norm=True, use_styles=True, lrmul=1.0, gain=1.0,
                   tile_budget_bytes=None, vmem_limit_bytes=None):
    """x_nchw: (B,C,H,W), noise_nchw: (B,1,H,W), dlatent: (B,D),
       noise_weight: (C,), style_w: (2C, D), style_b: (2C,)."""
    # TODO(synk): the noise=None (in-module torch.randn) path is not implemented;
    # callers must pass noise explicitly.
    B, C, H, W = x_nchw.shape
    HW = H * W
    D = dlatent.shape[1]

    itemsize = jnp.dtype(x_nchw.dtype).itemsize        # real storage itemsize
    auto_budget, auto_limit = _vmem_budget()
    if tile_budget_bytes is None:
        tile_budget_bytes = auto_budget
    if vmem_limit_bytes is None:
        vmem_limit_bytes = auto_limit

    T, HWp = _pick_tile(HW, C, itemsize, tile_budget_bytes)
    n_t = HWp // T
    inv_hw = 1.0 / HW       # always divide by the REAL pixel count

    # Natural (B, C, HW) layout — free views, HW on the lane axis.
    x3 = x_nchw.reshape(B, C, HW)
    noise3 = noise_nchw.reshape(B, 1, HW) if use_noise else None
    if HWp > HW:
        pad = HWp - HW
        x3 = jnp.pad(x3, ((0, 0), (0, 0), (0, pad)))
        if use_noise:
            noise3 = jnp.pad(noise3, ((0, 0), (0, 0), (0, pad)))

    if use_noise:
        nw = noise_weight.reshape(C, 1).astype(jnp.float32)

    if use_styles:
        # Hoisted ApplyStyle FC: one (B,D)x(D,2C) matmul for the whole batch.
        he_std = gain * (D ** -0.5)
        w_lrmul = he_std * lrmul if use_wscale else lrmul
        b_lrmul = lrmul
        s = (dlatent.astype(jnp.float32)
             @ (style_w.astype(jnp.float32) * w_lrmul).T
             + style_b.astype(jnp.float32) * b_lrmul)                  # (B, 2C)
        s = _leaky_relu(s, 0.2)
        s = s.reshape(B, 2, C, 1)
        scale = s[:, 0] + 1.0                                          # (B, C, 1), +1 folded in
        shift = s[:, 1]                                                # (B, C, 1)

    # ------------------------------------------------------------------ #
    # Fast path: whole (possibly padded) image resident in one VMEM tile.
    # Single grid step per image, everything fused, no scratch, no re-read.
    # ------------------------------------------------------------------ #
    if n_t == 1:
        def kernel(*refs):
            refs = list(refs)
            x_ref = refs.pop(0)
            noise_ref = refs.pop(0) if use_noise else None
            nw_ref = refs.pop(0) if use_noise else None
            scale_ref = refs.pop(0) if use_styles else None
            shift_ref = refs.pop(0) if use_styles else None
            o_ref = refs.pop(0)

            y = x_ref[...].astype(jnp.float32)                         # (C, T)
            if use_noise:
                y = y + nw_ref[...] * noise_ref[...].astype(jnp.float32)
            y = _leaky_relu(y, 0.2)
            if use_pixel_norm:
                m = jnp.mean(y * y, axis=0, keepdims=True)             # (1, T)
                y = y * lax.rsqrt(m + EPS)
            if use_instance_norm:
                # Padded columns of y are exactly zero, so sums over the padded
                # tile scaled by 1/HW_real are exact.
                mu = jnp.sum(y, axis=1, keepdims=True) * inv_hw        # (C, 1)
                s2 = jnp.sum(y * y, axis=1, keepdims=True) * inv_hw
                var = s2 - mu * mu
                y = (y - mu) * lax.rsqrt(var + EPS)
            if use_styles:
                y = y * scale_ref[...] + shift_ref[...]                # (C,1) bcast
            o_ref[...] = y.astype(o_ref.dtype)

        inputs = [x3]
        in_specs = [pl.BlockSpec((None, C, T), lambda b: (b, 0, 0))]
        if use_noise:
            inputs += [noise3, nw]
            in_specs += [pl.BlockSpec((None, 1, T), lambda b: (b, 0, 0)),
                         pl.BlockSpec((C, 1), lambda b: (0, 0))]
        if use_styles:
            inputs += [scale, shift]
            in_specs += [pl.BlockSpec((None, C, 1), lambda b: (b, 0, 0)),
                         pl.BlockSpec((None, C, 1), lambda b: (b, 0, 0))]
        out_spec = pl.BlockSpec((None, C, T), lambda b: (b, 0, 0))
        scratch = []
        grid = (B,)
        dims = ("parallel",)

    # ------------------------------------------------------------------ #
    # Tiled path: two-pass streaming instance-norm (only when the image does
    # not fit the VMEM block budget).
    # ------------------------------------------------------------------ #
    else:
        n_p = 2 if use_instance_norm else 1

        def kernel(*refs):
            refs = list(refs)
            x_ref = refs.pop(0)
            noise_ref = refs.pop(0) if use_noise else None
            nw_ref = refs.pop(0) if use_noise else None
            scale_ref = refs.pop(0) if use_styles else None
            shift_ref = refs.pop(0) if use_styles else None
            o_ref = refs.pop(0)
            sum_ref = refs.pop(0) if use_instance_norm else None
            ssq_ref = refs.pop(0) if use_instance_norm else None

            def activations():
                # noise + leaky_relu + pixel_norm; per-tile, f32 accumulation.
                y = x_ref[...].astype(jnp.float32)                     # (C, T)
                if use_noise:
                    y = y + nw_ref[...] * noise_ref[...].astype(jnp.float32)
                y = _leaky_relu(y, 0.2)
                if use_pixel_norm:
                    m = jnp.mean(y * y, axis=0, keepdims=True)         # (1, T)
                    y = y * lax.rsqrt(m + EPS)
                return y

            def finish(y):
                if use_styles:
                    y = y * scale_ref[...] + shift_ref[...]            # (C,1) bcast
                o_ref[...] = y.astype(o_ref.dtype)

            if use_instance_norm:
                p = pl.program_id(1)
                t = pl.program_id(2)

                @pl.when(p == 0)
                def _():
                    @pl.when(t == 0)
                    def _():
                        sum_ref[...] = jnp.zeros_like(sum_ref)
                        ssq_ref[...] = jnp.zeros_like(ssq_ref)
                    y = activations()
                    sum_ref[...] += jnp.sum(y, axis=1, keepdims=True)
                    ssq_ref[...] += jnp.sum(y * y, axis=1, keepdims=True)

                @pl.when(p == 1)
                def _():
                    y = activations()
                    mu = sum_ref[...] * inv_hw
                    var = ssq_ref[...] * inv_hw - mu * mu
                    finish((y - mu) * lax.rsqrt(var + EPS))
            else:
                finish(activations())

        inputs = [x3]
        in_specs = [pl.BlockSpec((None, C, T), lambda b, p, t: (b, 0, t))]
        if use_noise:
            inputs += [noise3, nw]
            in_specs += [pl.BlockSpec((None, 1, T), lambda b, p, t: (b, 0, t)),
                         pl.BlockSpec((C, 1), lambda b, p, t: (0, 0))]
        if use_styles:
            inputs += [scale, shift]
            in_specs += [pl.BlockSpec((None, C, 1), lambda b, p, t: (b, 0, 0)),
                         pl.BlockSpec((None, C, 1), lambda b, p, t: (b, 0, 0))]

        if use_instance_norm:
            # NOTE: pass 0 "parks" the output on block (b,0,0), which is never
            # written during pass 0 and whose index is unchanged until pass 1
            # overwrites it at t=0 — so no garbage block is ever flushed.  This
            # relies on Pallas only writing back an output block when its index
            # changes; the single-tile fast path above avoids the subtlety for
            # the common case.
            out_spec = pl.BlockSpec((None, C, T), lambda b, p, t: (b, 0, t * p))
            scratch = [pltpu.VMEM((C, 1), jnp.float32),   # per-channel sum
                       pltpu.VMEM((C, 1), jnp.float32)]   # per-channel sum of squares
        else:
            out_spec = pl.BlockSpec((None, C, T), lambda b, p, t: (b, 0, t))
            scratch = []
        grid = (B, n_p, n_t)
        dims = ("parallel", "arbitrary", "arbitrary")

    out = pl.pallas_call(
        kernel,
        out_shape=jax.ShapeDtypeStruct((B, C, HWp), x_nchw.dtype),
        grid_spec=pltpu.PrefetchScalarGridSpec(
            num_scalar_prefetch=0,
            grid=grid,
            in_specs=in_specs,
            out_specs=out_spec,
            scratch_shapes=scratch,
        ),
        compiler_params=pltpu.CompilerParams(
            dimension_semantics=dims,
            vmem_limit_bytes=int(vmem_limit_bytes)),
    )(*inputs)

    if HWp > HW:
        out = out[:, :, :HW]
    return out.reshape(B, C, H, W)


def layer_epilogue_ref(x, noise, dlatent, noise_weight, style_w, style_b,
                       *, use_wscale=True, lrmul=1.0, gain=1.0):
    """Plain-JAX reference (mirrors the PyTorch module with all flags True)."""
    B, C, H, W = x.shape
    D = dlatent.shape[1]
    x = x + noise_weight.reshape(1, C, 1, 1) * noise
    x = _leaky_relu(x, 0.2)
    # pixel norm
    x = x * lax.rsqrt(jnp.mean(x * x, axis=1, keepdims=True) + EPS)
    # instance norm
    x = x - jnp.mean(x, axis=(2, 3), keepdims=True)
    x = x * lax.rsqrt(jnp.mean(x * x, axis=(2, 3), keepdims=True) + EPS)
    # style
    he_std = gain * (D ** -0.5)
    w_lrmul = he_std * lrmul if use_wscale else lrmul
    s = dlatent @ (style_w * w_lrmul).T + style_b * lrmul
    s = _leaky_relu(s, 0.2)
    s = s.reshape(B, 2, C, 1, 1)
    return x * (s[:, 0] + 1.0) + s[:, 1]


if __name__ == "__main__":
    key = jax.random.PRNGKey(0)
    k1, k2, k3, k4, k5 = jax.random.split(key, 5)

    B, C, H, W = 2, 4, 16, 16
    D = 32  # dlatent_size

    x = jax.random.normal(k1, (B, C, H, W), dtype=jnp.float32)
    noise = jax.random.normal(k2, (B, 1, H, W), dtype=jnp.float32)
    dlatent = jax.random.normal(k3, (B, D), dtype=jnp.float32)

    # ApplyNoise.weight is zeros in __init__; use small random so the branch is exercised.
    noise_weight = 0.1 * jax.random.normal(k4, (C,), dtype=jnp.float32)
    # FC(latent_size, 2*channels) with use_wscale=True -> init_std = 1.0
    style_w = jax.random.normal(k5, (2 * C, D), dtype=jnp.float32)
    style_b = jnp.zeros((2 * C,), dtype=jnp.float32)

    ref = jax.block_until_ready(
        layer_epilogue_ref(x, noise, dlatent, noise_weight, style_w, style_b,
                           use_wscale=True))

    # 1) default path: whole image in a single lane-dense (C, HW) block,
    #    single fused pass (grid=(B,)), generation-aware VMEM budget.
    out1 = jax.block_until_ready(
        layer_epilogue(x, noise, dlatent, noise_weight, style_w, style_b,
                       use_wscale=True, use_noise=True, use_pixel_norm=True,
                       use_instance_norm=True, use_styles=True))
    assert out1.shape == (B, C, H, W)
    err1 = float(jnp.max(jnp.abs(out1 - ref)))
    assert jnp.allclose(out1, ref, atol=1e-4, rtol=1e-4), err1

    # 2) force HW tiling (two 128-lane tiles) to exercise the two-pass
    #    streaming instance-norm path used at very large resolutions.
    out2 = jax.block_until_ready(
        layer_epilogue(x, noise, dlatent, noise_weight, style_w, style_b,
                       use_wscale=True, use_noise=True, use_pixel_norm=True,
                       use_instance_norm=True, use_styles=True,
                       tile_budget_bytes=2048))
    err2 = float(jnp.max(jnp.abs(out2 - ref)))
    assert jnp.allclose(out2, ref, atol=1e-4, rtol=1e-4), err2

    # 3) non-128-divisible spatial size -> padded lane axis (padding is zero
    #    through the prologue so the HW statistics stay exact).
    Hp, Wp = 10, 10
    xp = jax.random.normal(k1, (B, C, Hp, Wp), dtype=jnp.float32)
    np_ = jax.random.normal(k2, (B, 1, Hp, Wp), dtype=jnp.float32)
    refp = jax.block_until_ready(
        layer_epilogue_ref(xp, np_, dlatent, noise_weight, style_w, style_b,
                           use_wscale=True))
    outp = jax.block_until_ready(
        layer_epilogue(xp, np_, dlatent, noise_weight, style_w, style_b,
                       use_wscale=True, use_noise=True, use_pixel_norm=True,
                       use_instance_norm=True, use_styles=True))
    errp = float(jnp.max(jnp.abs(outp - refp)))
    assert jnp.allclose(outp, refp, atol=1e-4, rtol=1e-4), errp

    print("KERNEL_OK")
</pallas_src>

<mosaic_0001>
module attributes {stable_mosaic.version = 11 : i64} {
  func.func @kernel(%arg0: i32, %arg1: memref<1x4x256xf32, #tpu.memory_space<vmem>>, %arg2: memref<1x1x256xf32, #tpu.memory_space<vmem>>, %arg3: memref<4x1xf32, #tpu.memory_space<vmem>>, %arg4: memref<1x4x1xf32, #tpu.memory_space<vmem>>, %arg5: memref<1x4x1xf32, #tpu.memory_space<vmem>>, %arg6: memref<1x4x256xf32, #tpu.memory_space<vmem>>) attributes {dimension_semantics = [#tpu.dimension_semantics<parallel>], iteration_bounds = array<i64: 2>, scalar_prefetch = 0 : i64, scratch_operands = 0 : i64, tpu.core_type = #tpu.core_type<tc>, window_params = [{transform_indices = @transform_0, window_bounds = array<i64: 1, 4, 256>}, {transform_indices = @transform_1, window_bounds = array<i64: 1, 1, 256>}, {pipeline_mode = #tpu.pipeline_mode<synchronous>, transform_indices = @transform_2, window_bounds = array<i64: 4, 1>}, {transform_indices = @transform_3, window_bounds = array<i64: 1, 4, 1>}, {transform_indices = @transform_4, window_bounds = array<i64: 1, 4, 1>}, {transform_indices = @transform_5, window_bounds = array<i64: 1, 4, 256>}]} {
    %c0 = arith.constant 0 : index
    %c0_0 = arith.constant 0 : index
    %c0_1 = arith.constant 0 : index
    %0 = vector.load %arg1[%c0, %c0_0, %c0_1] : memref<1x4x256xf32, #tpu.memory_space<vmem>>, vector<1x4x256xf32>
    %1 = vector.shape_cast %0 : vector<1x4x256xf32> to vector<4x256xf32>
    %c0_2 = arith.constant 0 : index
    %c0_3 = arith.constant 0 : index
    %2 = vector.load %arg3[%c0_2, %c0_3] : memref<4x1xf32, #tpu.memory_space<vmem>>, vector<4x1xf32>
    %c0_4 = arith.constant 0 : index
    %c0_5 = arith.constant 0 : index
    %c0_6 = arith.constant 0 : index
    %3 = vector.load %arg2[%c0_4, %c0_5, %c0_6] : memref<1x1x256xf32, #tpu.memory_space<vmem>>, vector<1x1x256xf32>
    %4 = vector.shape_cast %3 : vector<1x1x256xf32> to vector<1x256xf32>
    %5 = vector.broadcast %2 : vector<4x1xf32> to vector<4x256xf32>
    %6 = vector.broadcast %4 : vector<1x256xf32> to vector<4x256xf32>
    %7 = arith.mulf %5, %6 : vector<4x256xf32>
    %8 = arith.addf %1, %7 : vector<4x256xf32>
    %cst = arith.constant 0.000000e+00 : f32
    %9 = vector.broadcast %cst : f32 to vector<4x256xf32>
    %10 = arith.cmpf oge, %8, %9 : vector<4x256xf32>
    %cst_7 = arith.constant 2.000000e-01 : f32
    %11 = vector.broadcast %cst_7 : f32 to vector<4x256xf32>
    %12 = arith.mulf %11, %8 : vector<4x256xf32>
    %13 = arith.select %10, %8, %12 : vector<4x256xi1>, vector<4x256xf32>
    %14 = arith.mulf %13, %13 : vector<4x256xf32>
    %cst_8 = arith.constant dense<0.000000e+00> : vector<256xf32>
    %15 = vector.multi_reduction <add>, %14, %cst_8 [0] : vector<4x256xf32> to vector<256xf32>
    %16 = vector.shape_cast %15 : vector<256xf32> to vector<1x256xf32>
    %cst_9 = arith.constant 4.000000e+00 : f32
    %17 = vector.broadcast %cst_9 : f32 to vector<1x256xf32>
    %18 = arith.divf %16, %17 : vector<1x256xf32>
    %cst_10 = arith.constant 9.99999993E-9 : f32
    %19 = vector.broadcast %cst_10 : f32 to vector<1x256xf32>
    %20 = arith.addf %18, %19 : vector<1x256xf32>
    %21 = math.rsqrt %20 : vector<1x256xf32>
    %22 = vector.broadcast %21 : vector<1x256xf32> to vector<4x256xf32>
    %23 = arith.mulf %13, %22 : vector<4x256xf32>
    %cst_11 = arith.constant dense<0.000000e+00> : vector<4xf32>
    %24 = vector.multi_reduction <add>, %23, %cst_11 [1] : vector<4x256xf32> to vector<4xf32>
    %25 = vector.shape_cast %24 : vector<4xf32> to vector<4x1xf32>
    %cst_12 = arith.constant 3.906250e-03 : f32
    %26 = vector.broadcast %cst_12 : f32 to vector<4x1xf32>
    %27 = arith.mulf %25, %26 : vector<4x1xf32>
    %28 = arith.mulf %23, %23 : vector<4x256xf32>
    %cst_13 = arith.constant dense<0.000000e+00> : vector<4xf32>
    %29 = vector.multi_reduction <add>, %28, %cst_13 [1] : vector<4x256xf32> to vector<4xf32>
    %30 = vector.shape_cast %29 : vector<4xf32> to vector<4x1xf32>
    %cst_14 = arith.constant 3.906250e-03 : f32
    %31 = vector.broadcast %cst_14 : f32 to vector<4x1xf32>
    %32 = arith.mulf %30, %31 : vector<4x1xf32>
    %33 = arith.mulf %27, %27 : vector<4x1xf32>
    %34 = arith.subf %32, %33 : vector<4x1xf32>
    %35 = vector.broadcast %27 : vector<4x1xf32> to vector<4x256xf32>
    %36 = arith.subf %23, %35 : vector<4x256xf32>
    %cst_15 = arith.constant 9.99999993E-9 : f32
    %37 = vector.broadcast %cst_15 : f32 to vector<4x1xf32>
    %38 = arith.addf %34, %37 : vector<4x1xf32>
    %39 = math.rsqrt %38 : vector<4x1xf32>
    %40 = vector.broadcast %39 : vector<4x1xf32> to vector<4x256xf32>
    %41 = arith.mulf %36, %40 : vector<4x256xf32>
    %c0_16 = arith.constant 0 : index
    %c0_17 = arith.constant 0 : index
    %c0_18 = arith.constant 0 : index
    %42 = vector.load %arg4[%c0_16, %c0_17, %c0_18] : memref<1x4x1xf32, #tpu.memory_space<vmem>>, vector<1x4x1xf32>
    %43 = vector.shape_cast %42 : vector<1x4x1xf32> to vector<4x1xf32>
    %44 = vector.broadcast %43 : vector<4x1xf32> to vector<4x256xf32>
    %45 = arith.mulf %41, %44 : vector<4x256xf32>
    %c0_19 = arith.constant 0 : index
    %c0_20 = arith.constant 0 : index
    %c0_21 = arith.constant 0 : index
    %46 = vector.load %arg5[%c0_19, %c0_20, %c0_21] : memref<1x4x1xf32, #tpu.memory_space<vmem>>, vector<1x4x1xf32>
    %47 = vector.shape_cast %46 : vector<1x4x1xf32> to vector<4x1xf32>
    %48 = vector.broadcast %47 : vector<4x1xf32> to vector<4x256xf32>
    %49 = arith.addf %45, %48 : vector<4x256xf32>
    %c0_22 = arith.constant 0 : index
    %c0_23 = arith.constant 0 : index
    %c0_24 = arith.constant 0 : index
    %50 = vector.load %arg6[%c0_22, %c0_23, %c0_24] : memref<1x4x256xf32, #tpu.memory_space<vmem>>, vector<1x4x256xf32>
    %51 = vector.shape_cast %50 : vector<1x4x256xf32> to vector<4x256xf32>
    %52 = vector.shape_cast %49 : vector<4x256xf32> to vector<1x4x256xf32>
    tpu.vector_store %arg6[%c0_22, %c0_23, %c0_24], %52 {strides = array<i32>} : memref<1x4x256xf32, #tpu.memory_space<vmem>>, vector<1x4x256xf32>,
    return
  }
  func.func @transform_0(%arg0: i32) -> (i32, i32, i32) {
    %c0_i32 = arith.constant 0 : i32
    %c0_i32_0 = arith.constant 0 : i32
    %c0_i32_1 = arith.constant 0 : i32
    return %arg0, %c0_i32, %c0_i32_0 : i32, i32, i32
  }
  func.func @transform_1(%arg0: i32) -> (i32, i32, i32) {
    %c0_i32 = arith.constant 0 : i32
    %c0_i32_0 = arith.constant 0 : i32
    %c0_i32_1 = arith.constant 0 : i32
    return %arg0, %c0_i32, %c0_i32_0 : i32, i32, i32
  }
  func.func @transform_2(%arg0: i32) -> (i32, i32) {
    %c0_i32 = arith.constant 0 : i32
    %c0_i32_0 = arith.constant 0 : i32
    %c0_i32_1 = arith.constant 0 : i32
    return %c0_i32, %c0_i32_0 : i32, i32
  }
  func.func @transform_3(%arg0: i32) -> (i32, i32, i32) {
    %c0_i32 = arith.constant 0 : i32
    %c0_i32_0 = arith.constant 0 : i32
    %c0_i32_1 = arith.constant 0 : i32
    return %arg0, %c0_i32, %c0_i32_0 : i32, i32, i32
  }
  func.func @transform_4(%arg0: i32) -> (i32, i32, i32) {
    %c0_i32 = arith.constant 0 : i32
    %c0_i32_0 = arith.constant 0 : i32
    %c0_i32_1 = arith.constant 0 : i32
    return %arg0, %c0_i32, %c0_i32_0 : i32, i32, i32
  }
  func.func @transform_5(%arg0: i32) -> (i32, i32, i32) {
    %c0_i32 = arith.constant 0 : i32
    %c0_i32_0 = arith.constant 0 : i32
    %c0_i32_1 = arith.constant 0 : i32
    return %arg0, %c0_i32, %c0_i32_0 : i32, i32, i32
  }
}

</mosaic_0001>

<bundles_post_ra>
// kernel: tpu_custom_call.1
= control target key start
LH: loop header
LB: loop body
LE: loop exit
PB: predicated region body
PF: predicated region fallthrough
CT: control target
= control target key end

     0   :  { %10 = vsyncpa [#allocation3], 0  ;;  %s811_s0 = inlined_call_operand.vmem [shape: f32[2,4,256], index: 0, kind: input, shape index: {}]   ;;  %s812_s1 = inlined_call_operand.vmem [shape: f32[2,1,256], index: 1, kind: input, shape index: {}]   ;;  %s813_s2 = inlined_call_operand.vmem [shape: f32[4,1], index: 2, kind: input, shape index: {}]   ;;  %s814_s3 = inlined_call_operand.vmem [shape: f32[2,4,1], index: 3, kind: input, shape index: {}]   ;;  %s815_s4 = inlined_call_operand.vmem [shape: f32[2,4,1], index: 4, kind: input, shape index: {}]   ;;  %s816_s5 = inlined_call_operand.hbm [shape: f32[2,4,256], index: 5, kind: output, shape index: {}]  }
   0x1   :  { %12 = vsyncpa [#allocation3 + $0x1], 0  ;;  %s679_s18 = smov 0   ;;  %s681_s19 = smov 0  }
   0x2   :  { %s683_s20 = smov 0   ;;  %s685_s21 = smov 0  }
   0x3 LB: > { %s700_s22 = sadd.s32 4294967295, %s644_s21   ;;  %s516_s23 = sadd.s32 4294967294, %s644_s21   ;;  %s644_s21 = sphi %s685_s21, %s822_s21   ;;  %s640_s20 = sphi %s683_s20, %s821_s20   ;;  %s636_s19 = sphi %s681_s19, %s820_s19   ;;  %s632_s18 = sphi %s679_s18, %s819_s18  }
   0x4   : > { %s704_s24 = sadd.s32 1, %s644_s21   ;;  %s150_s25 = sadd.s32 1, %s640_s20 }
   0x5   : > { %s147_s26 = ssub.s32 %s644_s21, %s704_s24  ;;  %p160_p0 = scmp.ne.s32.totalorder %s640_s20, %s636_s19 }
   0x6   : > { %p148_p1 = scmp.eq.s32.totalorder %s147_s26, 0  ;;  %p161_p2 = scmp.eq.s32.totalorder %s700_s22, 1 }
   0x7   : > { %p166_p3 = scmp.ne.s32.totalorder %s636_s19, %s632_s18  ;;  %p167_p4 = scmp.eq.s32.totalorder %s516_s23, 1 }
   0x8   : > { %s715_s27 = scalar_select %p148_p1, %s640_s20, %s150_s25  }
   0x9   : > { %p717_p5 = por %p161_p2, %p160_p0  ;;  %p721_p6 = por %p167_p4, %p166_p3 }
   0xa   : > { %p519_p7 = scmp.ge.s32.totalorder %s644_s21, 1  ;;  %p217_p8 = scmp.lt.s32.totalorder %s644_s21, 3 }
   0xc   : > { %p218_p9 = pnand %p519_p7, %p217_p8 }
   0xd   : > { %v275_v0 = vld [vmem:[%s813_s2] sm:$0xf] (!%p218_p9)  ;;  %v646_v1 = vmov (!%p218_p9), 0   ;;  %p257_p10 = scmp.lt.s32.totalorder (!%p218_p9), %s700_s22, 1  ;;  %v283_v3 = vlaneseq (!%p218_p9)  ;;  %vm307_vm1 = vcmask (!%p218_p9), 1043456   ;;  %s532_s9 = sshll.u32 (!%p218_p9), %s700_s22, 7 }
   0xe   : > { %221 = sbr.rel (%p218_p9) target bundleno = 376 (0x178), region = 40  ;;  %574 = vset.pattern.permute.xlu0 (!%p218_p9), %v646_v1  ;;  %575 = vset.pattern.permute.xlu1 (!%p218_p9), %v646_v1  ;;  %v647_v59 = vmov (!%p218_p9), 839922192   ;;  %s769_s14 = scalar_lea.hbm (!%p218_p9), %s816_s5, %s532_s9 }
   0xf   : > { %279 = vperm.xlu0 (!%p218_p9), %574, %v275_v0   ;;  %v741_v4 = vshrl.u32 (!%p218_p9), %v283_v3, 7  ;;  %v357_v60 = vunpack.c.l.s4 (!%p218_p9), %v647_v59 }
  0x11   : > { %v285_v5 = vsub.s32 (!%p218_p9), 0, %v741_v4  ;;  %v289_v6 = vsub.s32 (!%p218_p9), 1, %v741_v4  ;;  %v358_v62 = vunpack.c.0.s8 (!%p218_p9), %v357_v60 }
  0x13   : > { %v361_v63 = vsub.s32 (!%p218_p9), %v358_v62, %v741_v4 }
  0x15   : > { %s732_s7 = scalar_select %p257_p10, %s700_s22, 1 }
  0x16   : > { %s648_s22 = smov [#allocation2]  }
  0x17   : > { %s524_s8 = sshll.u32 %s732_s7, 2  ;;  %s523_s12 = sshll.u32 %s732_s7, 1 }
  0x18   : > { %s269_s11 = scalar_lea.vmem %s814_s3, %s524_s8  ;;  %s265_s15 = scalar_lea.vmem %s812_s1, %s523_s12 }
  0x19   : > { %v377_v2 = vld [vmem:[%s269_s11] sm:$0xf]  ;;  %s531_s16 = sshll.u32 %s732_s7, 3  ;;  %s273_s6 = scalar_lea.vmem %s815_s4, %s524_s8 }
  0x1a   : > { %380 = vperm.xlu1 %575, %v377_v2   ;;  %v276_v7 = vld [vmem:[%s265_s15] sm:$0x3]  ;;  %s261_s25 = scalar_lea.vmem %s811_s0, %s531_s16  ;;  %s254_s7 = sand.u32 1, %s636_s19  }
  0x1b   : > { %v286_v8 = vrot.slane %v276_v7, %v285_v5  ;;  %v290_v9 = vrot.slane %v276_v7, %v289_v6  ;;  %v274_v13 = vld [vmem:[%s261_s25] sm:$0xff]  ;;  %s520_s8 = sshll.u32 %s254_s7, 3  ;;  %s407_s15 = scalar_lea.sflag [#allocation3], %s254_s7 }
  0x1c   : > { %v391_v51 = vld [vmem:[%s273_s6] sm:$0xf]  ;;  %s256_s10 = scalar_lea.vmem [#allocation2], %s520_s8  ;;  %s586_s17 = sshll.u32 %s648_s22, 4  ;;  %s587_s17 = int_to_ptr.vmem [resolvable:$false] %s586_s17 }
  0x1d   : > { %s421_s11 = sshll.u32 %s256_s10, 4  ;;  %s588_s23 = scalar_lea.vmem %s587_s17, 256  ;;  %s771_s11 = int_to_ptr.vmem [resolvable:$true] %s421_s11 }
  0x1e   : > { %s582_s16 = scalar_lea.vmem %s771_s11, 128  ;;  %p589_p0 = scmp.lt.s32.totalorder %s771_s11, %s587_s17 }
  0x1f   : > { %p583_p11 = scmp.ne.s32.totalorder %s771_s11, %s582_s16  ;;  %p590_p1 = scmp.lt.s32.totalorder %s588_s23, %s582_s16 }
  0x21   : > { %p584_p12 = pnand %p583_p11, %p717_p5  ;;  %p591_p2 = por %p590_p1, %p589_p0 }
  0x23   : > { %p585_p13 = pneg %p584_p12 }
  0x25   : > { %p592_p3 = pnand %p591_p2, %p585_p13 }
  0x8e   : > { %v280_v10 = vpop.permute.xlu0 %279 }
  0x8f   : > { %v293_v11 = vmul.f32 %v286_v8, %v280_v10  ;;  %v294_v12 = vmul.f32 %v290_v9, %v280_v10 }
  0x91   : > { %v297_v14 = vcombine.low %v293_v11, %v294_v12 }
  0x93   : > { %v299_v15 = vadd.f32 %v297_v14, %v274_v13 }
  0x95   : > { %vm300_vm0 = vcmp.ge.f32.partialorder %v299_v15, 0.0  ;;  %v301_v16 = vmul.f32 0.2, %v299_v15 }
  0x97   : > { %v302_v17 = vsel %vm300_vm0, %v299_v15, %v301_v16 }
  0x98   : > { %v303_v18 = vmul.f32 %v302_v17, %v302_v17 }
  0x99   : > { %v381_v52 = vpop.permute.xlu1 %380 }
  0x9a   : > { %v305_v19 = vcombine.high %v303_v18, %v303_v18  ;;  %v308_v20 = vsel %vm307_vm1, %v303_v18, 0.0  ;;  %v388_v6 = vrot.slane %v381_v52, %v361_v63 }
  0x9b   : > { %v309_v21 = vrot.slane %v308_v20, 4 }
  0x9c   : > { %v315_v22 = vsel %vm307_vm1, %v305_v19, 0.0 }
  0x9d   : > { %v310_v23 = vadd.f32 %v309_v21, %v308_v20  ;;  %v316_v24 = vrot.slane %v315_v22, 4 }
  0x9f   : > { %v311_v25 = vrot.slane %v310_v23, 2  ;;  %v317_v26 = vadd.f32 %v316_v24, %v315_v22 }
  0xa1   : > { %v312_v27 = vadd.f32 %v311_v25, %v310_v23  ;;  %v318_v28 = vrot.slane %v317_v26, 2 }
  0xa3   : > { %v313_v29 = vrot.slane %v312_v27, 1  ;;  %v319_v30 = vadd.f32 %v318_v28, %v317_v26 }
  0xa5   : > { %v314_v31 = vadd.f32 %v313_v29, %v312_v27  ;;  %v320_v32 = vrot.slane %v319_v30, 1 }
  0xa7   : > { %v321_v33 = vadd.f32 %v320_v32, %v319_v30  ;;  %v323_v34 = vmul.f32 0.25, %v314_v31 }
  0xa9   : > { %v324_v35 = vmul.f32 0.25, %v321_v33  ;;  %v325_v36 = vadd.f32 1e-08, %v323_v34 }
  0xab   : > { %v326_v37 = vadd.f32 1e-08, %v324_v35  ;;  %576 = vrsqrt.f32 %v325_v36 }
  0xad   : > { %578 = vrsqrt.f32 %v326_v37 }
  0xb5   : > { %v577_v38 = vpop.eup %576 }
  0xb7   : > { %v579_v39 = vpop.eup %578 }
  0xb8   : > { %v331_v40 = vcombine.low %v577_v38, %v579_v39 }
  0xba   : > { %v333_v41 = vmul.f32 %v331_v40, %v302_v17 }
  0xbc   : > { %v335_v42 = vcombine.high %v333_v41, %v333_v41  ;;  %v343_v43 = vmul.f32 %v333_v41, %v333_v41  ;;  %v337_v44 = vsel %vm307_vm1, %v333_v41, 0.0 }
  0xbe   : > { %v338_v45 = vsel %vm307_vm1, %v335_v42, 0.0  ;;  %v345_v46 = vcombine.high %v343_v43, %v343_v43  ;;  %v347_v48 = vsel %vm307_vm1, %v343_v43, 0.0 }
  0xbf   : > { %v339_v47 = vadd.f32 %v338_v45, %v337_v44 }
  0xc0   : > { %v348_v49 = vsel %vm307_vm1, %v345_v46, 0.0 }
  0xc1   : > { %340 = vadd.xlane.f32.xlu0 %v339_v47  ;;  %v349_v50 = vadd.f32 %v348_v49, %v347_v48 }
  0xc3   : > { %350 = vadd.xlane.f32.xlu1 %v349_v50 }
  0xd4   : > { %394 = vperm.xlu1 %575, %v391_v51  }
 0x14e   : > { %v341_v53 = vpop.xlane.xlu0 %340 }
 0x14f   : > { %v342_v54 = vmul.f32 0.00390625, %v341_v53 }
 0x150   : > { %v351_v55 = vpop.xlane.xlu1 %350 }
 0x151   : > { %v353_v56 = vmul.f32 %v342_v54, %v342_v54  ;;  %v352_v57 = vmul.f32 0.00390625, %v351_v55  ;;  %v362_v0 = vrot.slane %v342_v54, %v361_v63 }
 0x153   : > { %v354_v58 = vsub.f32 %v352_v57, %v353_v56  ;;  %v364_v2 = vsub.f32 %v333_v41, %v362_v0 }
 0x154   : > { %v395_v5 = vpop.permute.xlu1 %394 }
 0x155   : > { %v365_v61 = vadd.f32 1e-08, %v354_v58  ;;  %v402_v9 = vrot.slane %v395_v5, %v361_v63 }
 0x157   : > { %580 = vrsqrt.f32 %v365_v61 }
 0x161   : > { %v581_v1 = vpop.eup %580 }
 0x162   : > { %v374_v3 = vrot.slane %v581_v1, %v361_v63 }
 0x164   : > { %v376_v7 = vmul.f32 %v374_v3, %v364_v2 }
 0x166   : > { %v390_v8 = vmul.f32 %v388_v6, %v376_v7 }
 0x168   : > { %v404_v10 = vadd.f32 %v402_v9, %v390_v8 }
 0x16a   : > { %405 = vst [vmem:[%s256_s10] sm:$0xff] %v404_v10 }
 0x16b   : > { %595 = shalt.err (!%p592_p3)
}
 0x16c   : > { %s596_s25 = scalar_lea.hbm %s769_s14, 128  ;;  %s600_s6 = scalar_lea.hbm %s816_s5, 256 }
 0x16d   : > { %p597_p4 = scmp.ne.s32.totalorder %s769_s14, %s596_s25  ;;  %p601_p9 = scmp.lt.u32.totalorder %s769_s14, %s816_s5 }
 0x16e   : > { %p602_p10 = scmp.lt.u32.totalorder %s600_s6, %s596_s25  ;;  %p604_p12 = scmp.lt.u32.totalorder %s596_s25, %s769_s14 }
 0x16f   : > { %p598_p7 = pnand %p597_p4, %p717_p5 }
 0x170   : > { %p603_p11 = por %p602_p10, %p601_p9 }
 0x171   : > { %p599_p8 = pneg %p598_p7 }
 0x172   : > { %p605_p13 = por %p604_p12, %p603_p11 }
 0x174   : > { %p606_p0 = pnand %p605_p13, %p599_p8 }
 0x176   : > { %609 = shalt.err (!%p606_p0)
}
 0x177   : > { %533 = dma.vmem_to_hbm [thread:$0]  (%p717_p5), %s771_s11, 128, %s769_s14, %s407_s15  }
 0x178 PF: > { %p539_p1 = scmp.ge.s32.totalorder %s644_s21, 2  ;;  %s433_s9 = sand.u32 1, %s632_s18  }
 0x179   : > { %s434_s10 = scalar_lea.sflag [#allocation3], %s433_s9 }
 0x17a   : > { %p536_p2 = pnand %p539_p1, %p721_p6 }
 0x17c   : > { %627 = dma.done.wait (!%p536_p2), %s434_s10, 128  }
 0x17d   : > { %629 = vsyncadd (!%p536_p2), %s434_s10, 4294967168  ;;  %p15_p3 = scmp.ge.s32.totalorder %s704_s24, 4   ;;  %s819_s18 = smov %s636_s19 }
 0x17e   : > { %s820_s19 = smov %s640_s20  ;;  %s821_s20 = smov %s715_s27 }
 0x17f   : > { %s822_s21 = smov %s704_s24  ;;  %17 = sbr.rel (!%p15_p3) target bundleno = 3 (0x3), region = 84 }
 0x186   :  { %439 = vsyncpa [#allocation3], 1 }
 0x187   :  { %441 = vsyncpa [#allocation3 + $0x1], 1 }

</bundles_post_ra>
